<compile_context>
chip_gen: v7x
topology: tpu7x:2x2x1
jax: 0.10.0
libtpu: 0.0.40
codegen_flags: <defaults>
</compile_context>

<pallas_src>
import numpy as np
import jax
import jax.numpy as jnp
from jax.experimental import pallas as pl
from jax.experimental.pallas import tpu as pltpu


def _param_block_kernel(x_ref, w_ref, b_ref, o_ref):
    # x_ref/o_ref: (bt, R, tile_s)   w_ref/b_ref: (R, tile_s)
    # Pure VPU fused multiply-add; w/b broadcast along the batch dim only.
    o_ref[...] = x_ref[...] * w_ref[...][None, :, :] + b_ref[...][None, :, :]


def _largest_divisor_leq(n, cap):
    cap = max(1, min(n, int(cap)))
    for d in range(cap, 0, -1):
        if n % d == 0:
            return d
    return 1


def _largest_aligned_divisor_leq(n, align, cap):
    """Largest divisor of n that is a multiple of `align` and <= cap.

    Assumes n % align == 0; returns at least `align`."""
    best = align
    d = align
    while d <= n:
        if n % d == 0 and d <= cap:
            best = d
        d += align
    return best


def param_block_forward(x, w, b, *, target_block_bytes=4 * 1024 * 1024,
                        min_pallas_bytes=1 * 1024 * 1024, force_pallas=False):
    """x: (B, C_out, D1, D2, D3); w: (C_out, D1, D2, D3); b: (C_out,)."""
    B, C_out = x.shape[0], x.shape[1]
    spatial = x.shape[2:]
    assert len(spatial) == 3, "ParamBlock uses a 3-D trailing shape"
    assert w.shape == (C_out, *spatial) and b.shape == (C_out,)
    D1, D2, D3 = spatial

    # PyTorch-style type promotion, done once in the wrapper.
    out_dtype = jnp.result_type(x.dtype, w.dtype, b.dtype)
    itemsize = jnp.dtype(out_dtype).itemsize

    # Tiny problems: a standalone kernel's launch + per-step overhead dwarfs
    # moving a few KiB; let XLA fuse the FMA into neighbouring ops instead.
    total_x_bytes = int(np.prod(x.shape)) * itemsize
    if not force_pallas and total_x_bytes < min_pallas_bytes:
        bb = b.astype(out_dtype).reshape((1, C_out, 1, 1, 1))
        return w.astype(out_dtype)[None] * x.astype(out_dtype) + bb

    R = C_out * D1          # sublane axis (8 for the lffont shapes)
    S = D2 * D3             # lane axis (128 for the lffont shapes)

    x_flat = x.astype(out_dtype).reshape(B, R, S)
    w_flat = w.astype(out_dtype).reshape(R, S)
    b_rows = jnp.repeat(b.astype(out_dtype), D1)            # one value per fused row
    # TODO(synk): in a real model keep activations in this fused (B, R, S)
    # layout end-to-end so the wrapper reshape cannot materialize a relayout.

    # Sub-32-bit dtypes: fold batch pairs/quads into the row axis so packed
    # sublanes (bf16 -> 16 rows, int8 -> 32 rows) stay full.
    pack = max(1, 4 // itemsize)
    row_align = 8 * pack
    fold = 1
    if R % row_align != 0:
        for g in range(2, min(B, row_align) + 1):
            if B % g == 0 and (g * R) % row_align == 0:
                fold = g
                break
    if fold > 1:
        B_k, R_k = B // fold, fold * R
        x_flat = x_flat.reshape(B_k, R_k, S)
        w_flat = jnp.tile(w_flat, (fold, 1))
        b_rows = jnp.tile(b_rows, (fold,))
    else:
        B_k, R_k = B, R

    # Pad S to a multiple of 128 so every store is an unmasked full-vreg vst.
    S_pad = ((S + 127) // 128) * 128
    if S_pad != S:
        x_flat = jnp.pad(x_flat, ((0, 0), (0, 0), (0, S_pad - S)))
        w_flat = jnp.pad(w_flat, ((0, 0), (0, S_pad - S)))

    # Tile selection: prefer full-S blocks (long contiguous DMA bursts), then
    # pack batch elements per step up to the per-block byte budget.
    row_bytes = R_k * S_pad * itemsize
    if row_bytes <= target_block_bytes:
        tile_s = S_pad
        bt = _largest_divisor_leq(B_k, target_block_bytes // row_bytes)
    else:
        bt = 1
        tile_s = _largest_aligned_divisor_leq(
            S_pad, 128, max(128, target_block_bytes // (R_k * itemsize)))

    # Guarantee >= 2 grid steps on bandwidth-bound problems so both of v7x's
    # TensorCores get work ("parallel" axes only help with >= 2 steps).
    num_s, num_b = S_pad // tile_s, B_k // bt
    if num_s * num_b == 1 and total_x_bytes > min_pallas_bytes:
        if bt % 2 == 0:
            bt //= 2
        elif bt > 1:
            bt = _largest_divisor_leq(B_k, bt - 1)
        elif tile_s % 256 == 0:
            tile_s //= 2
        num_s, num_b = S_pad // tile_s, B_k // bt

    grid = (num_s, num_b)   # batch innermost -> w block index constant there

    # Bias pre-broadcast to one lane-dense tile; constant index -> fetched once.
    b_tile = jnp.broadcast_to(b_rows[:, None], (R_k, tile_s))

    # VMEM footprint: double-buffered x + out blocks, double-buffered w block,
    # single b tile, plus headroom.  Clamp to v7x's 64 MiB physical VMEM.
    x_block_bytes = bt * R_k * tile_s * itemsize
    wb_block_bytes = R_k * tile_s * itemsize
    vmem_limit = 4 * x_block_bytes + 3 * wb_block_bytes + (2 << 20)
    vmem_limit = int(min(max(vmem_limit, 16 * 1024 * 1024), 64 * 1024 * 1024))

    cost = pl.CostEstimate(
        flops=2 * B_k * R_k * S_pad,
        transcendentals=0,
        bytes_accessed=(2 * B_k * R_k * S_pad          # x read + out write
                        + num_s * R_k * S_pad          # w fetched once per S-tile
                        + R_k * tile_s) * itemsize,    # b fetched once
    )

    out_flat = pl.pallas_call(
        _param_block_kernel,
        out_shape=jax.ShapeDtypeStruct((B_k, R_k, S_pad), out_dtype),
        grid=grid,
        in_specs=[
            pl.BlockSpec((bt, R_k, tile_s), lambda s, i: (i, 0, s)),
            pl.BlockSpec((R_k, tile_s), lambda s, i: (0, s)),  # constant over inner axis
            pl.BlockSpec((R_k, tile_s), lambda s, i: (0, 0)),  # constant everywhere
        ],
        out_specs=pl.BlockSpec((bt, R_k, tile_s), lambda s, i: (i, 0, s)),
        compiler_params=pltpu.CompilerParams(
            dimension_semantics=("parallel", "parallel"),
            vmem_limit_bytes=vmem_limit,
        ),
        cost_estimate=cost,
    )(x_flat, w_flat, b_tile)

    out = out_flat.reshape(B, R, S_pad)
    if S_pad != S:
        out = out[:, :, :S]
    return out.reshape(x.shape)


if __name__ == "__main__":
    key = jax.random.PRNGKey(0)
    k1, k2, k3, k4, k5, k6 = jax.random.split(key, 6)

    # --- Test 1: the lffont ParamBlock shapes (C_out=4, shape=(2, 8, 16)),
    # forced through the Pallas path (the dispatcher would otherwise hand this
    # 8 KiB problem to plain XLA fusion, per the perf review).
    B, C_out, shape = 2, 4, (2, 8, 16)
    w = jax.random.normal(k1, (C_out, *shape), dtype=jnp.float32)
    b = jax.random.normal(k2, (C_out,), dtype=jnp.float32)
    x = jax.random.normal(k3, (B, C_out, *shape), dtype=jnp.float32)

    out = jax.block_until_ready(param_block_forward(x, w, b, force_pallas=True))
    ref = w[None] * x + b.reshape(1, C_out, 1, 1, 1)
    np.testing.assert_allclose(np.asarray(out), np.asarray(ref),
                               rtol=1e-6, atol=1e-6)

    # --- Test 2: multi-step grid with an unaligned lane axis (S=480 -> padded
    # to 512) and a small block budget, exercising batch tiling with the
    # constant-w inner axis, the row-fold path, and lane padding.
    B2, C2, shape2 = 8, 4, (3, 12, 40)
    w2 = jax.random.normal(k4, (C2, *shape2), dtype=jnp.float32)
    b2 = jax.random.normal(k5, (C2,), dtype=jnp.float32)
    x2 = jax.random.normal(k6, (B2, C2, *shape2), dtype=jnp.float32)

    out2 = jax.block_until_ready(
        param_block_forward(x2, w2, b2, target_block_bytes=64 * 1024,
                            force_pallas=True))
    ref2 = w2[None] * x2 + b2.reshape(1, C2, 1, 1, 1)
    np.testing.assert_allclose(np.asarray(out2), np.asarray(ref2),
                               rtol=1e-6, atol=1e-6)

    print("KERNEL_OK")
</pallas_src>

<mosaic_0001>
module attributes {stable_mosaic.version = 11 : i64} {
  func.func @_param_block_kernel(%arg0: i32, %arg1: i32, %arg2: memref<2x8x128xf32, #tpu.memory_space<vmem>>, %arg3: memref<8x128xf32, #tpu.memory_space<vmem>>, %arg4: memref<8x128xf32, #tpu.memory_space<vmem>>, %arg5: memref<2x8x128xf32, #tpu.memory_space<vmem>>) attributes {dimension_semantics = [#tpu.dimension_semantics<parallel>, #tpu.dimension_semantics<parallel>], iteration_bounds = array<i64: 1, 1>, scalar_prefetch = 0 : i64, scratch_operands = 0 : i64, tpu.core_type = #tpu.core_type<tc>, window_params = [{transform_indices = @transform_0, window_bounds = array<i64: 2, 8, 128>}, {transform_indices = @transform_1, window_bounds = array<i64: 8, 128>}, {pipeline_mode = #tpu.pipeline_mode<synchronous>, transform_indices = @transform_2, window_bounds = array<i64: 8, 128>}, {transform_indices = @transform_3, window_bounds = array<i64: 2, 8, 128>}]} {
    %c0 = arith.constant 0 : index
    %c0_0 = arith.constant 0 : index
    %c0_1 = arith.constant 0 : index
    %0 = vector.load %arg2[%c0, %c0_0, %c0_1] : memref<2x8x128xf32, #tpu.memory_space<vmem>>, vector<2x8x128xf32>
    %c0_2 = arith.constant 0 : index
    %c0_3 = arith.constant 0 : index
    %1 = vector.load %arg3[%c0_2, %c0_3] : memref<8x128xf32, #tpu.memory_space<vmem>>, vector<8x128xf32>
    %2 = vector.shape_cast %1 : vector<8x128xf32> to vector<1x8x128xf32>
    %3 = vector.broadcast %2 : vector<1x8x128xf32> to vector<2x8x128xf32>
    %4 = arith.mulf %0, %3 : vector<2x8x128xf32>
    %c0_4 = arith.constant 0 : index
    %c0_5 = arith.constant 0 : index
    %5 = vector.load %arg4[%c0_4, %c0_5] : memref<8x128xf32, #tpu.memory_space<vmem>>, vector<8x128xf32>
    %6 = vector.shape_cast %5 : vector<8x128xf32> to vector<1x8x128xf32>
    %7 = vector.broadcast %6 : vector<1x8x128xf32> to vector<2x8x128xf32>
    %8 = arith.addf %4, %7 : vector<2x8x128xf32>
    %c0_6 = arith.constant 0 : index
    %c0_7 = arith.constant 0 : index
    %c0_8 = arith.constant 0 : index
    %9 = vector.load %arg5[%c0_6, %c0_7, %c0_8] : memref<2x8x128xf32, #tpu.memory_space<vmem>>, vector<2x8x128xf32>
    tpu.vector_store %arg5[%c0_6, %c0_7, %c0_8], %8 {strides = array<i32>} : memref<2x8x128xf32, #tpu.memory_space<vmem>>, vector<2x8x128xf32>,
    return
  }
  func.func @transform_0(%arg0: i32, %arg1: i32) -> (i32, i32, i32) {
    %c0_i32 = arith.constant 0 : i32
    %c0_i32_0 = arith.constant 0 : i32
    return %arg1, %c0_i32, %arg0 : i32, i32, i32
  }
  func.func @transform_1(%arg0: i32, %arg1: i32) -> (i32, i32) {
    %c0_i32 = arith.constant 0 : i32
    %c0_i32_0 = arith.constant 0 : i32
    return %c0_i32, %arg0 : i32, i32
  }
  func.func @transform_2(%arg0: i32, %arg1: i32) -> (i32, i32) {
    %c0_i32 = arith.constant 0 : i32
    %c0_i32_0 = arith.constant 0 : i32
    %c0_i32_1 = arith.constant 0 : i32
    return %c0_i32, %c0_i32_0 : i32, i32
  }
  func.func @transform_3(%arg0: i32, %arg1: i32) -> (i32, i32, i32) {
    %c0_i32 = arith.constant 0 : i32
    %c0_i32_0 = arith.constant 0 : i32
    return %arg1, %c0_i32, %arg0 : i32, i32, i32
  }
}

</mosaic_0001>

<bundles_post_ra>
// kernel: tpu_custom_call.1
= control target key start
LH: loop header
LB: loop body
LE: loop exit
PB: predicated region body
PF: predicated region fallthrough
CT: control target
= control target key end

     0   :  { %8 = vsyncpa [#allocation3], 0  ;;  %s267_s0 = inlined_call_operand.hbm [shape: f32[2,8,128], index: 0, kind: input, shape index: {}]   ;;  %s268_s1 = inlined_call_operand.hbm [shape: f32[8,128], index: 1, kind: input, shape index: {}]   ;;  %s269_s2 = inlined_call_operand.hbm [shape: f32[8,128], index: 2, kind: input, shape index: {}]   ;;  %s270_s3 = inlined_call_operand.hbm [shape: f32[2,8,128], index: 3, kind: output, shape index: {}]  }
   0x1   :  { %9 = vsyncpa [#allocation6], 0 }
   0x2   :  { %10 = vsyncpa [#allocation4], 0  ;;  %s180_s12 = smov [#allocation5]   ;;  %s181_s14 = smov [#allocation2]  }
   0x3   :  { %s29_s13 = sshll.u32 %s180_s12, 4  ;;  %s16_s15 = sshll.u32 %s181_s14, 4  ;;  %s30_s13 = int_to_ptr.vmem [resolvable:$true] %s29_s13  ;;  %s206_s15 = int_to_ptr.vmem [resolvable:$true] %s16_s15 }
   0x4   :  { %s86_s18 = scalar_lea.hbm %s268_s1, 128 }
   0x5   :  { %p87_p0 = scmp.ne.s32.totalorder %s268_s1, %s86_s18  ;;  %p90_p1 = scmp.lt.u32.totalorder %s86_s18, %s268_s1 }
   0x7   :  { %p92_p2 = pnand %p90_p1, %p87_p0 }
   0x9   :  { %95 = shalt.err (!%p92_p2)
}
   0xa   :  { %s96_s23 = scalar_lea.vmem %s30_s13, 128  ;;  %p101_p4 = scmp.lt.s32.totalorder %s30_s13, %s30_s13 }
   0xb   :  { %p97_p3 = scmp.ne.s32.totalorder %s30_s13, %s96_s23  ;;  %p102_p5 = scmp.lt.s32.totalorder %s96_s23, %s96_s23 }
   0xd   :  { %p103_p6 = por %p102_p5, %p101_p4 }
   0xf   :  { %p104_p7 = pnand %p103_p6, %p97_p3 }
  0x11   :  { %107 = shalt.err (!%p104_p7)
}
  0x12   :  { %32 = dma.hbm_to_vmem [thread:$0]  %s268_s1, 128, %s30_s13, [#allocation6]  }
  0x13   :  { %s108_s28 = scalar_lea.hbm %s267_s0, 256 }
  0x14   :  { %p109_p8 = scmp.ne.s32.totalorder %s267_s0, %s108_s28  ;;  %p112_p9 = scmp.lt.u32.totalorder %s108_s28, %s267_s0 }
  0x16   :  { %p114_p10 = pnand %p112_p9, %p109_p8 }
  0x18   :  { %117 = shalt.err (!%p114_p10)
}
  0x19   :  { %s118_s6 = scalar_lea.vmem %s206_s15, 256  ;;  %p123_p12 = scmp.lt.s32.totalorder %s206_s15, %s206_s15 }
  0x1a   :  { %p119_p11 = scmp.ne.s32.totalorder %s206_s15, %s118_s6  ;;  %p124_p13 = scmp.lt.s32.totalorder %s118_s6, %s118_s6 }
  0x1c   :  { %p125_p0 = por %p124_p13, %p123_p12 }
  0x1e   :  { %p126_p1 = pnand %p125_p0, %p119_p11 }
  0x20   :  { %129 = shalt.err (!%p126_p1)
}
  0x21   :  { %s182_s1 = smov 128   ;;  %s183_s7 = smov 8  }
  0x22   :  { %22 = dma.hbm_to_vmem [thread:$0]  %s267_s0, 256, %s206_s15, [#allocation3], %s182_s1, %s182_s1, %s183_s7  }
  0x23   :  { %s184_s10 = smov [#allocation7]   ;;  %s130_s14 = scalar_lea.hbm %s269_s2, 128 }
  0x24   :  { %s39_s11 = sshll.u32 %s184_s10, 4  ;;  %p131_p2 = scmp.ne.s32.totalorder %s269_s2, %s130_s14  ;;  %s40_s11 = int_to_ptr.vmem [resolvable:$true] %s39_s11 }
  0x25   :  { %p134_p3 = scmp.lt.u32.totalorder %s130_s14, %s269_s2 }
  0x27   :  { %p136_p4 = pnand %p134_p3, %p131_p2 }
  0x29   :  { %139 = shalt.err (!%p136_p4)
}
  0x2a   :  { %s140_s20 = scalar_lea.vmem %s40_s11, 128  ;;  %p145_p6 = scmp.lt.s32.totalorder %s40_s11, %s40_s11 }
  0x2b   :  { %p141_p5 = scmp.ne.s32.totalorder %s40_s11, %s140_s20  ;;  %p146_p7 = scmp.lt.s32.totalorder %s140_s20, %s140_s20 }
  0x2d   :  { %p147_p8 = por %p146_p7, %p145_p6 }
  0x2f   :  { %p148_p9 = pnand %p147_p8, %p141_p5 }
  0x31   :  { %151 = shalt.err (!%p148_p9)
}
  0x32   :  { %42 = dma.hbm_to_vmem [thread:$0]  %s269_s2, 128, %s40_s11, [#allocation6]  }
  0x33   :  { %174 = dma.done.wait [#allocation3], 256  }
  0x34   :  { %175 = vsyncadd [#allocation3], 4294967040 }
  0x35   :  { %176 = dma.done.wait [#allocation6], 256  }
  0x36   :  { %177 = vsyncadd [#allocation6], 4294967040  ;;  %v52_v0 = vld [vmem:[#allocation2] sm:$0xff]  ;;  %v54_v1 = vld [vmem:[#allocation5] sm:$0xff]  ;;  %s185_s21 = smov [#allocation8]  }
  0x37   :  { %v57_v2 = vld [vmem:[#allocation7] sm:$0xff]  ;;  %v55_v3 = vmul.f32 %v54_v1, %v52_v0  ;;  %v53_v4 = vld [vmem:[#allocation2 + $0x8] sm:$0xff]  ;;  %s67_s22 = sshll.u32 %s185_s21, 4  ;;  %s68_s22 = int_to_ptr.vmem [resolvable:$true] %s67_s22 }
  0x38   :  { %v56_v5 = vmul.f32 %v54_v1, %v53_v4  ;;  %s152_s23 = scalar_lea.vmem %s68_s22, 256  ;;  %p157_p11 = scmp.lt.s32.totalorder %s68_s22, %s68_s22 }
  0x39   :  { %v58_v6 = vadd.f32 %v57_v2, %v55_v3  ;;  %p153_p10 = scmp.ne.s32.totalorder %s68_s22, %s152_s23  ;;  %p158_p12 = scmp.lt.s32.totalorder %s152_s23, %s152_s23 }
  0x3a   :  { %v59_v7 = vadd.f32 %v57_v2, %v56_v5 }
  0x3b   :  { %60 = vst [vmem:[#allocation8] sm:$0xff] %v58_v6  ;;  %p159_p13 = por %p158_p12, %p157_p11 }
  0x3c   :  { %61 = vst [vmem:[#allocation8 + $0x8] sm:$0xff] %v59_v7 }
  0x3d   :  { %p160_p0 = pnand %p159_p13, %p153_p10 }
  0x3f   :  { %163 = shalt.err (!%p160_p0)
}
  0x40   :  { %s164_s25 = scalar_lea.hbm %s270_s3, 256 }
  0x41   :  { %p165_p1 = scmp.ne.s32.totalorder %s270_s3, %s164_s25  ;;  %p168_p2 = scmp.lt.u32.totalorder %s164_s25, %s270_s3 }
  0x43   :  { %p170_p3 = pnand %p168_p2, %p165_p1 }
  0x45   :  { %173 = shalt.err (!%p170_p3)
}
  0x46   :  { %73 = dma.vmem_to_hbm [thread:$0]  %s68_s22, 256, %s270_s3, [#allocation4], %s182_s1, %s182_s1, %s183_s7  }
  0x47   :  { %178 = dma.done.wait [#allocation4], 256  }
  0x48   :  { %179 = vsyncadd [#allocation4], 4294967040 }
  0x49   :  { %77 = vsyncpa [#allocation3], 1 }
  0x4a   :  { %78 = vsyncpa [#allocation6], 1 }
  0x4b   :  { %79 = vsyncpa [#allocation4], 1 }

</bundles_post_ra>
